<compile_context>
chip_gen: v5e
topology: v5e:2x2
jax: 0.10.0
libtpu: 0.0.40
codegen_flags: <defaults>
</compile_context>

<pallas_src>
import math
from functools import partial

import jax
import jax.numpy as jnp
from jax.experimental import pallas as pl
from jax.experimental.pallas import tpu as pltpu


def _round_up(x, m):
    return ((x + m - 1) // m) * m


def _cdiv(a, b):
    return (a + b - 1) // b


def _supports_bf16_eup():
    """True on TPU generations with native bf16 VPU/EUP (v6e and newer)."""
    try:
        kind = jax.devices()[0].device_kind.lower()
    except Exception:
        return False
    for old in ("v2", "v3", "v4", "v5"):
        if old in kind:
            return False
    return True


def mdn_kernel(x_ref, w1_ref, b1_ref, w2_ref, o_ref, *, tanh_bf16):
    # Cast the streamed f32 x tile to bf16 in VMEM (VPU) right before the MXU.
    xb = x_ref[...].astype(jnp.bfloat16)
    # fc1: (TB, H)bf16 @ (H, 128)bf16 -> f32 accumulator, bias add in f32.
    h = jnp.dot(xb, w1_ref[...], preferred_element_type=jnp.float32)
    h = h + b1_ref[...]
    if tanh_bf16:
        # bf16 tanh on bf16-capable EUP (v6e/v7x); also the fc2 operand dtype.
        h = jnp.tanh(h.astype(jnp.bfloat16))
    else:
        # v5e and older: keep tanh in f32, cast only for the MXU operand.
        h = jnp.tanh(h).astype(jnp.bfloat16)
    # fc2 (no bias): (TB, 128)bf16 @ (128, OUT)bf16 -> f32.
    out = jnp.dot(h, w2_ref[...], preferred_element_type=jnp.float32)
    o_ref[...] = out.astype(o_ref.dtype)


def _choose_tile(B, block_batch, min_tiles=2):
    """Batch tile: multiple of 8, capped by block_batch, and (when possible)
    producing >= min_tiles grid steps so v7x megacore has work for both TCs."""
    n = max(_cdiv(B, block_batch), 1)
    if n < min_tiles:
        n = min(min_tiles, _cdiv(B, 8))  # keep each tile >= 8 rows
    n = max(n, 1)
    return max(_round_up(_cdiv(B, n), 8), 8)


def prepare_params(w1, b1, w2):
    """One-time packing of torch-layout-transposed params into kernel dtypes."""
    return (w1.astype(jnp.bfloat16),
            b1.astype(jnp.float32).reshape(1, -1),
            w2.astype(jnp.bfloat16))


def mdn_forward(x, w1, b1, w2, *, block_batch=4096):
    """Fused MDN forward.

    Shapes:
       x  : (B, hidden_dim)               f32
       w1 : (hidden_dim, 128)             bf16/f32  (pre-transposed vs. torch)
       b1 : (1, 128)                      f32
       w2 : (128, num_mixtures * 6)       bf16/f32  (pre-transposed vs. torch)
       out: (B, num_mixtures * 6)         f32
    """
    B, H = x.shape
    out_dim = w2.shape[1]

    # Idempotent dtype guards (no-ops / elided under jit if already prepared).
    x = x.astype(jnp.float32)
    w1b = w1.astype(jnp.bfloat16)
    w2b = w2.astype(jnp.bfloat16)
    b1f = b1.astype(jnp.float32).reshape(1, -1)

    tb = _choose_tile(B, block_batch)
    grid = (_cdiv(B, tb),)

    tanh_bf16 = _supports_bf16_eup()

    out = pl.pallas_call(
        partial(mdn_kernel, tanh_bf16=tanh_bf16),
        out_shape=jax.ShapeDtypeStruct((B, out_dim), jnp.float32),
        grid_spec=pltpu.PrefetchScalarGridSpec(
            num_scalar_prefetch=0,
            grid=grid,
            in_specs=[
                # x: streamed per batch tile (ragged last tile handled by Pallas).
                pl.BlockSpec((tb, H), lambda i: (i, 0)),
                # Weights / bias: constant index maps -> VMEM-resident across grid.
                pl.BlockSpec((H, 128), lambda i: (0, 0)),
                pl.BlockSpec((1, 128), lambda i: (0, 0)),
                pl.BlockSpec((128, out_dim), lambda i: (0, 0)),
            ],
            out_specs=pl.BlockSpec((tb, out_dim), lambda i: (i, 0)),
        ),
        compiler_params=pltpu.CompilerParams(
            dimension_semantics=("parallel",),   # shard batch tiles across TCs (v7x)
            vmem_limit_bytes=32 * 1024 * 1024,
        ),
    )(x, w1b, b1f, w2b)

    return out


def init_params(key, hidden_dim, num_mixtures):
    """Deterministic init mimicking PyTorch's default nn.Linear init
    (uniform in +/- 1/sqrt(fan_in)); weights stored pre-transposed, f32."""
    k1, k2, k3 = jax.random.split(key, 3)
    bound1 = 1.0 / math.sqrt(hidden_dim)
    w1 = jax.random.uniform(k1, (hidden_dim, 128), jnp.float32, -bound1, bound1)
    b1 = jax.random.uniform(k2, (1, 128), jnp.float32, -bound1, bound1)
    bound2 = 1.0 / math.sqrt(128)
    w2 = jax.random.uniform(k3, (128, num_mixtures * 6), jnp.float32, -bound2, bound2)
    return w1, b1, w2


def mdn_reference(x, w1, b1, w2, tanh_bf16):
    """Reference mirroring the kernel's bf16-operand / f32-accumulate path."""
    xb = x.astype(jnp.bfloat16)
    w1b = w1.astype(jnp.bfloat16)
    w2b = w2.astype(jnp.bfloat16)
    h = jnp.dot(xb, w1b, preferred_element_type=jnp.float32) + b1.astype(jnp.float32)
    if tanh_bf16:
        h = jnp.tanh(h.astype(jnp.bfloat16))
    else:
        h = jnp.tanh(h).astype(jnp.bfloat16)
    return jnp.dot(h, w2b, preferred_element_type=jnp.float32)


def mdn_reference_f32(x, w1, b1, w2):
    h = jnp.tanh(jnp.dot(x, w1) + b1)
    return jnp.dot(h, w2)


if __name__ == "__main__":
    hidden_dim = 32
    num_mixtures = 5
    batch = 8

    key = jax.random.PRNGKey(0)
    kx, kp = jax.random.split(key)
    x = jax.random.normal(kx, (batch, hidden_dim), dtype=jnp.float32)
    w1, b1, w2 = init_params(kp, hidden_dim, num_mixtures)

    # One-time parameter packing (bf16 weights, f32 bias), jitted forward.
    w1b, b1f, w2b = prepare_params(w1, b1, w2)
    mdn = jax.jit(mdn_forward)

    out = mdn(x, w1b, b1f, w2b)
    out = jax.block_until_ready(out)

    assert out.shape == (batch, num_mixtures * 6)

    # Tight check vs. a reference that mirrors the exact kernel precision path,
    # plus a loose sanity check vs. pure-f32 math (bf16 rounding slack).
    ref_bf16 = mdn_reference(x, w1, b1, w2, _supports_bf16_eup())
    assert jnp.allclose(out, ref_bf16, atol=1e-2, rtol=1e-2)
    ref_f32 = mdn_reference_f32(x, w1, b1, w2)
    assert jnp.allclose(out, ref_f32, atol=5e-2, rtol=5e-2)

    # TODO(synk): log_likelihood() is a separate (non-forward) method and is
    # intentionally not ported here.

    print("KERNEL_OK")
</pallas_src>

<mosaic_0001>
module attributes {stable_mosaic.version = 11 : i64} {
  func.func @mdn_kernel(%arg0: i32, %arg1: memref<8x32xf32, #tpu.memory_space<vmem>>, %arg2: memref<32x128xbf16, #tpu.memory_space<vmem>>, %arg3: memref<1x128xf32, #tpu.memory_space<vmem>>, %arg4: memref<128x30xbf16, #tpu.memory_space<vmem>>, %arg5: memref<8x30xf32, #tpu.memory_space<vmem>>) attributes {dimension_semantics = [#tpu.dimension_semantics<parallel>], iteration_bounds = array<i64: 1>, scalar_prefetch = 0 : i64, scratch_operands = 0 : i64, tpu.core_type = #tpu.core_type<tc>, window_params = [{transform_indices = @transform_0, window_bounds = array<i64: 8, 32>}, {pipeline_mode = #tpu.pipeline_mode<synchronous>, transform_indices = @transform_1, window_bounds = array<i64: 32, 128>}, {pipeline_mode = #tpu.pipeline_mode<synchronous>, transform_indices = @transform_2, window_bounds = array<i64: 1, 128>}, {pipeline_mode = #tpu.pipeline_mode<synchronous>, transform_indices = @transform_3, window_bounds = array<i64: 128, 30>}, {transform_indices = @transform_4, window_bounds = array<i64: 8, 30>}]} {
    %c0 = arith.constant 0 : index
    %c0_0 = arith.constant 0 : index
    %0 = vector.load %arg1[%c0, %c0_0] : memref<8x32xf32, #tpu.memory_space<vmem>>, vector<8x32xf32>
    %1 = arith.truncf %0 : vector<8x32xf32> to vector<8x32xbf16>
    %c0_1 = arith.constant 0 : index
    %c0_2 = arith.constant 0 : index
    %2 = vector.load %arg2[%c0_1, %c0_2] : memref<32x128xbf16, #tpu.memory_space<vmem>>, vector<32x128xbf16>
    %cst = arith.constant dense<0.000000e+00> : vector<8x128xf32>
    %3 = tpu.matmul %1, %2, %cst {dimension_numbers = #tpu.dot_dimension_numbers<[1], [0], [0], [1], [0, 0, 1, 1], [], []>} : vector<8x32xbf16>, vector<32x128xbf16>, vector<8x128xf32> -> vector<8x128xf32>
    %c0_3 = arith.constant 0 : index
    %c0_4 = arith.constant 0 : index
    %4 = vector.load %arg3[%c0_3, %c0_4] : memref<1x128xf32, #tpu.memory_space<vmem>>, vector<1x128xf32>
    %5 = vector.broadcast %4 : vector<1x128xf32> to vector<8x128xf32>
    %6 = arith.addf %3, %5 : vector<8x128xf32>
    %7 = arith.truncf %6 : vector<8x128xf32> to vector<8x128xbf16>
    %8 = math.tanh %7 : vector<8x128xbf16>
    %c0_5 = arith.constant 0 : index
    %c0_6 = arith.constant 0 : index
    %9 = vector.load %arg4[%c0_5, %c0_6] : memref<128x30xbf16, #tpu.memory_space<vmem>>, vector<128x30xbf16>
    %cst_7 = arith.constant dense<0.000000e+00> : vector<8x30xf32>
    %10 = tpu.matmul %8, %9, %cst_7 {dimension_numbers = #tpu.dot_dimension_numbers<[1], [0], [0], [1], [0, 0, 1, 1], [], []>} : vector<8x128xbf16>, vector<128x30xbf16>, vector<8x30xf32> -> vector<8x30xf32>
    %c0_8 = arith.constant 0 : index
    %c0_9 = arith.constant 0 : index
    %11 = vector.load %arg5[%c0_8, %c0_9] : memref<8x30xf32, #tpu.memory_space<vmem>>, vector<8x30xf32>
    tpu.vector_store %arg5[%c0_8, %c0_9], %10 {strides = array<i32>} : memref<8x30xf32, #tpu.memory_space<vmem>>, vector<8x30xf32>,
    return
  }
  func.func @transform_0(%arg0: i32) -> (i32, i32) {
    %c0_i32 = arith.constant 0 : i32
    %c0_i32_0 = arith.constant 0 : i32
    return %arg0, %c0_i32 : i32, i32
  }
  func.func @transform_1(%arg0: i32) -> (i32, i32) {
    %c0_i32 = arith.constant 0 : i32
    %c0_i32_0 = arith.constant 0 : i32
    %c0_i32_1 = arith.constant 0 : i32
    return %c0_i32, %c0_i32_0 : i32, i32
  }
  func.func @transform_2(%arg0: i32) -> (i32, i32) {
    %c0_i32 = arith.constant 0 : i32
    %c0_i32_0 = arith.constant 0 : i32
    %c0_i32_1 = arith.constant 0 : i32
    return %c0_i32, %c0_i32_0 : i32, i32
  }
  func.func @transform_3(%arg0: i32) -> (i32, i32) {
    %c0_i32 = arith.constant 0 : i32
    %c0_i32_0 = arith.constant 0 : i32
    %c0_i32_1 = arith.constant 0 : i32
    return %c0_i32, %c0_i32_0 : i32, i32
  }
  func.func @transform_4(%arg0: i32) -> (i32, i32) {
    %c0_i32 = arith.constant 0 : i32
    %c0_i32_0 = arith.constant 0 : i32
    return %arg0, %c0_i32 : i32, i32
  }
}

</mosaic_0001>

<bundles_post_ra>
// kernel: mdn_forward.1
= control target key start
LH: loop header
LB: loop body
LE: loop exit
PB: predicated region body
PF: predicated region fallthrough
CT: control target
= control target key end

     0   :  { %s303_s0 = inlined_call_operand.vmem [shape: f32[8,32], index: 0, kind: input, shape index: {}]   ;;  %s304_s1 = inlined_call_operand.vmem [shape: bf16[32,128], index: 1, kind: input, shape index: {}]   ;;  %s305_s2 = inlined_call_operand.vmem [shape: f32[1,128], index: 2, kind: input, shape index: {}]   ;;  %s306_s3 = inlined_call_operand.vmem [shape: bf16[128,30], index: 3, kind: input, shape index: {}]   ;;  %s307_s4 = inlined_call_operand.hbm [shape: f32[8,30], index: 4, kind: output, shape index: {}]  }
   0x1   :  { %v199_v0 = vld [vmem:[%s304_s1 + $0x8] sm:$0xff]  ;;  %v207_v1 = vld [vmem:[%s306_s3 + $0x38] sm:$0xff]  ;;  %v198_v2 = vld [vmem:[%s304_s1] sm:$0xff] }
   0x2   :  { %51 = vmatpush.bf16.msra.mxu0 %v199_v0  ;;  %v19_v3 = vld [vmem:[%s303_s0] sm:$0xff]  ;;  %126 = vmatpush.bf16.msra.mxu1 %v207_v1  ;;  %v206_v4 = vld [vmem:[%s306_s3 + $0x30] sm:$0xff] }
   0x3   :  { %9 = vsyncpa [#allocation3], 0  ;;  %v20_v5 = vpack.c.bf16 %v19_v3, %v19_v3  ;;  %vm41_vm0 = vcmask 261120   ;;  %v205_v6 = vld [vmem:[%s306_s3 + $0x28] sm:$0xff]  ;;  %v204_v7 = vld [vmem:[%s306_s3 + $0x20] sm:$0xff]  ;;  %s238_s11 = smov [#allocation2]  }
   0x4   :  { %v203_v8 = vld [vmem:[%s306_s3 + $0x18] sm:$0xff]  ;;  %v202_v9 = vld [vmem:[%s306_s3 + $0x10] sm:$0xff]  ;;  %v201_v10 = vld [vmem:[%s306_s3 + $0x8] sm:$0xff]  ;;  %s146_s12 = sshll.u32 %s238_s11, 4  ;;  %vm139_vm1 = vcmask 244736   ;;  %s147_s12 = int_to_ptr.vmem [resolvable:$true] %s146_s12 }
   0x5   :  { %v200_v11 = vld [vmem:[%s306_s3] sm:$0xff]  ;;  %s148_s3 = sshll.u32 %s307_s4, 4  ;;  %s149_s3 = int_to_ptr.hbm [resolvable:$true] %s148_s3 }
   0x6   :  { %52 = vmatpush.bf16.msra.mxu0 %v198_v2  ;;  %127 = vmatpush.bf16.msra.mxu1 %v206_v4  ;;  %v209_v12 = vld [vmem:[%s305_s2] ss:$0 sm:$0xff] }
   0x9   :  { %165 = vmatmul.msk.bf16.vlgmr.msra.gmra.mxu0 %vm41_vm0, %v20_v5 }
   0xa   :  { %128 = vmatpush.bf16.msra.mxu1 %v205_v6 }
   0xe   :  { %129 = vmatpush.bf16.msra.mxu1 %v204_v7 }
  0x12   :  { %130 = vmatpush.bf16.msra.mxu1 %v203_v8 }
  0x16   :  { %131 = vmatpush.bf16.msra.mxu1 %v202_v9 }
  0x1a   :  { %132 = vmatpush.bf16.msra.mxu1 %v201_v10 }
  0x1e   :  { %133 = vmatpush.bf16.msra.mxu1 %v200_v11 }
  0x86   :  { %v54_v13 = vpop.f32.mrf.mxu0 }
  0x87   :  { %v55_v14 = vadd.f32 %v209_v12, %v54_v13 }
  0x89   :  { %v58_v15 = vpack.c.bf16 %v55_v14, %v55_v14 }
  0x8b   :  { %v59_v16 = vunpack.c.l.bf16 %v58_v15 }
  0x8d   :  { %210 = vtanh.f32 %v59_v16 }
  0x8e   :  { %v56_v17 = vpop.f32.mrf.mxu0 }
  0x93   :  { %v211_v18 = vpop.eup %210 }
  0x94   :  { %v61_v19 = vpack.c.bf16 %v211_v18, %v211_v18 }
  0x96   :  { %134 = vmatmul.bf16.vlgmr.msra.gmra.mxu1 %v61_v19 }
 0x113   :  { %v135_v20 = vpop.f32.mrf.mxu1 }
 0x114   :  { %140 = vst.msk [vmem:[#allocation2] sm:$0xff] %vm139_vm1, %v135_v20 }
 0x115   :  { %151 = dma.vmem_to_hbm [thread:$0]  %s147_s12, 128, %s149_s3, [#allocation3]  }
 0x11b   :  { %v137_v21 = vpop.f32.mrf.mxu1 }
 0x11c   :  { %236 = dma.done.wait [#allocation3], 128  }
 0x11d   :  { %237 = vsyncadd [#allocation3], 4294967168 }
 0x11e   :  { %156 = vsyncpa [#allocation3], 1 }

</bundles_post_ra>
